<compile_context>
chip_gen: v6e
topology: v6e:2x2x1
jax: 0.10.0
libtpu: 0.0.40
codegen_flags: <defaults>
</compile_context>

<pallas_src>
import functools

import jax
import jax.numpy as jnp
from jax.experimental import pallas as pl
from jax.experimental.pallas import tpu as pltpu

LANES = 128
SUBLANES = 8


def _vmem_budget_bytes():
    """Returns (input working-set budget, vmem_limit_bytes), per TPU generation."""
    cap = 64 * 1024 * 1024  # conservative fallback = v7x per-TC physical VMEM
    try:
        info = pltpu.get_tpu_info()
        cap = int(getattr(info, "vmem_capacity_bytes", cap))
    except Exception:
        pass
    # ~40% of physical VMEM for the double-buffered input tiles, capped at 48 MiB:
    #   v5e/v6e (128 MiB) -> 48 MiB, v7x (64 MiB) -> ~25 MiB.
    workset = max(16 * 1024 * 1024, min(48 * 1024 * 1024, int(cap * 0.4)))
    limit = min(cap - 2 * 1024 * 1024, workset + 8 * 1024 * 1024)
    return workset, int(limit)


def _choose_fold(r, s):
    """Fold factor G (divisor of s) so R' = r*G is a multiple of 8 and >= 16.

    Guarantees the 'parallel' row grid axis can have extent >= 2 even when
    N*C is tiny (megacore / dual-TC utilization on v7x)."""
    if r % 8 == 0 and r >= 16:
        return 1
    best = 1
    for g in (2, 4, 8, 16, 32, 64, 128, 256):
        if s % g:
            continue
        rp = r * g
        if rp % 8 == 0:
            best = g
            if rp >= 16:
                return g
    return best


def _choose_row_tile(rp, row_budget):
    """Multiple-of-8 divisor of rp, small-capped (wide-tc-first), >=2 row tiles."""
    if rp % 8 != 0:
        return rp  # full extent satisfies the (8,128) rule
    cap = min(256, max(SUBLANES, (row_budget // SUBLANES) * SUBLANES), rp)
    if rp >= 2 * SUBLANES:
        cap = min(cap, rp // 2)  # guarantee n_row >= 2 when possible
    cap -= cap % SUBLANES
    for t in range(max(cap, SUBLANES), SUBLANES - 1, -SUBLANES):
        if rp % t == 0:
            return t
    return rp


def _hra_kernel(p_ref, l_ref, num_ref, wsum_ref, *,
                alpha, smooth, tc, total_cols, need_mask):
    j = pl.program_id(1)            # reduction (column) axis, innermost/"arbitrary"
    last = pl.num_programs(1) - 1

    @pl.when(j == 0)
    def _():
        num_ref[...] = jnp.zeros_like(num_ref)
        wsum_ref[...] = jnp.zeros_like(wsum_ref)

    p = p_ref[...].astype(jnp.float32)
    l = l_ref[...].astype(jnp.float32)
    hit = jnp.abs(l - p) > alpha

    def accumulate(p_val, hit_val):
        # where() selects (cheaper than hit.astype * l * logp); log -> EUP,
        # per-step row reduce -> XLU, so the VALU slot stays light.
        num_ref[...] += jnp.sum(
            jnp.where(hit_val, l, 0.0) * jnp.log(p_val + smooth),
            axis=-1, keepdims=True)
        wsum_ref[...] += jnp.sum(
            jnp.where(hit_val, 1.0, 0.0), axis=-1, keepdims=True)

    if not need_mask:
        accumulate(p, hit)
    else:
        # Hot path: unmasked. Only the (single) ragged last column block pays
        # for the iota/where masking.
        @pl.when(j != last)
        def _():
            accumulate(p, hit)

        @pl.when(j == last)
        def _():
            tr = p.shape[0]
            col = j * tc + jax.lax.broadcasted_iota(jnp.int32, (tr, tc), 1)
            valid = col < total_cols
            # Keep log() finite in the padded lanes (0 * NaN would poison sums).
            accumulate(jnp.where(valid, p, 1.0), jnp.logical_and(hit, valid))


def hra_loss(predict, label, alpha=0.1):
    """Pallas implementation of HRA.forward. Returns a () float32 scalar."""
    assert predict.shape == label.shape
    assert predict.ndim >= 3, "expects (N, C, *spatial)"
    smooth = 1e-6

    n, c = predict.shape[0], predict.shape[1]
    r = n * c
    s = 1
    for d in predict.shape[2:]:
        s *= int(d)

    # Fold part of the reduction dim into rows (copy-free reshape, no padding).
    g = _choose_fold(r, s)
    rp, sp = r * g, s // g
    p2 = predict.reshape(rp, sp)
    l2 = label.reshape(rp, sp)

    workset, vmem_limit = _vmem_budget_bytes()
    # Working set per element = 2 inputs x 2 pipeline buffers x native itemsize
    # (accumulators are only (tr, 1) resident outputs -> negligible).
    bytes_per_elem = 2 * 2 * predict.dtype.itemsize

    # Wide-first split of the budget: size tc assuming the minimal row tile,
    # then give tr whatever is left (capped small).
    col_budget = max(LANES, workset // (bytes_per_elem * SUBLANES))
    tc = sp if sp <= col_budget else max(LANES, (col_budget // LANES) * LANES)
    row_budget = max(SUBLANES, workset // (bytes_per_elem * tc))
    tr = _choose_row_tile(rp, row_budget)

    n_row = pl.cdiv(rp, tr)
    n_col = pl.cdiv(sp, tc)
    need_mask = (n_col * tc) != sp

    kernel = functools.partial(
        _hra_kernel,
        alpha=float(alpha),
        smooth=smooth,
        tc=tc,
        total_cols=sp,
        need_mask=need_mask,
    )

    in_bytes = 2 * r * s * predict.dtype.itemsize
    num_p, wsum_p = pl.pallas_call(
        kernel,
        out_shape=(jax.ShapeDtypeStruct((rp, 1), jnp.float32),
                   jax.ShapeDtypeStruct((rp, 1), jnp.float32)),
        grid_spec=pltpu.PrefetchScalarGridSpec(
            num_scalar_prefetch=0,
            grid=(n_row, n_col),
            in_specs=[
                pl.BlockSpec((tr, tc), lambda i, j: (i, j)),
                pl.BlockSpec((tr, tc), lambda i, j: (i, j)),
            ],
            out_specs=[
                pl.BlockSpec((tr, 1), lambda i, j: (i, 0)),
                pl.BlockSpec((tr, 1), lambda i, j: (i, 0)),
            ],
        ),
        compiler_params=pltpu.CompilerParams(
            dimension_semantics=("parallel", "arbitrary"),
            vmem_limit_bytes=vmem_limit,
        ),
        cost_estimate=pl.CostEstimate(
            flops=9 * r * s,
            transcendentals=r * s,
            bytes_accessed=in_bytes + 8 * rp,
        ),
    )(p2, l2)

    # Tiny wrapper-side combine: un-fold the G partial sums per (n, c) row,
    # form the ratio (denominator sum(w + smooth) = sum(w) + smooth*S), mean.
    # NOTE: wsum counts hits in f32 -> exact only up to 2^24 elements per row.
    num = num_p[:, 0].reshape(r, g).sum(axis=-1)
    wsum = wsum_p[:, 0].reshape(r, g).sum(axis=-1)
    loss_ce = -num / (wsum + smooth * float(s))
    return jnp.mean(loss_ce)


def _hra_ref(predict, label, alpha=0.1):
    """Pure-JAX reference matching the PyTorch module."""
    smooth = 1e-6
    w = jnp.abs(label - predict)
    w = jnp.where(w > alpha, 1.0, 0.0)
    num = -jnp.sum(w * label * jnp.log(predict + smooth), axis=(2, 3, 4))
    den = jnp.sum(w + smooth, axis=(2, 3, 4))
    return jnp.mean(num / den)


if __name__ == "__main__":
    key = jax.random.PRNGKey(0)
    k1, k2 = jax.random.split(key)

    # Small 5-D (N, C, D, H, W) volume consistent with the 3-D loss.
    shape = (2, 4, 8, 16, 16)
    predict = jax.random.uniform(k1, shape, dtype=jnp.float32,
                                 minval=0.01, maxval=0.99)
    label = (jax.random.uniform(k2, shape) > 0.5).astype(jnp.float32)

    result = hra_loss(predict, label, alpha=0.1)
    result = jax.block_until_ready(result)

    ref = _hra_ref(predict, label, alpha=0.1)
    assert jnp.allclose(result, ref, rtol=1e-5, atol=1e-5), (result, ref)

    print("KERNEL_OK")
</pallas_src>

<mosaic_0001>
module attributes {stable_mosaic.version = 11 : i64} {
  func.func @_hra_kernel(%arg0: i32, %arg1: i32, %arg2: memref<8x1024xf32, #tpu.memory_space<vmem>>, %arg3: memref<8x1024xf32, #tpu.memory_space<vmem>>, %arg4: memref<8x1xf32, #tpu.memory_space<vmem>>, %arg5: memref<8x1xf32, #tpu.memory_space<vmem>>) attributes {dimension_semantics = [#tpu.dimension_semantics<parallel>, #tpu.dimension_semantics<arbitrary>], iteration_bounds = array<i64: 2, 1>, scalar_prefetch = 0 : i64, scratch_operands = 0 : i64, tpu.core_type = #tpu.core_type<tc>, window_params = [{transform_indices = @transform_0, window_bounds = array<i64: 8, 1024>}, {transform_indices = @transform_1, window_bounds = array<i64: 8, 1024>}, {transform_indices = @transform_2, window_bounds = array<i64: 8, 1>}, {transform_indices = @transform_3, window_bounds = array<i64: 8, 1>}]} {
    %c0_i32 = arith.constant 0 : i32
    %0 = arith.cmpi eq, %arg1, %c0_i32 : i32
    %1 = arith.extui %0 : i1 to i32
    %c0_i32_0 = arith.constant 0 : i32
    %2 = arith.cmpi ne, %1, %c0_i32_0 : i32
    scf.if %2 {
      %cst_18 = arith.constant 0.000000e+00 : f32
      %28 = vector.broadcast %cst_18 : f32 to vector<8x1xf32>
      %c0_19 = arith.constant 0 : index
      %c0_20 = arith.constant 0 : index
      %29 = vector.load %arg4[%c0_19, %c0_20] : memref<8x1xf32, #tpu.memory_space<vmem>>, vector<8x1xf32>
      tpu.vector_store %arg4[%c0_19, %c0_20], %28 {strides = array<i32>} : memref<8x1xf32, #tpu.memory_space<vmem>>, vector<8x1xf32>,
      %cst_21 = arith.constant 0.000000e+00 : f32
      %30 = vector.broadcast %cst_21 : f32 to vector<8x1xf32>
      %c0_22 = arith.constant 0 : index
      %c0_23 = arith.constant 0 : index
      %31 = vector.load %arg5[%c0_22, %c0_23] : memref<8x1xf32, #tpu.memory_space<vmem>>, vector<8x1xf32>
      tpu.vector_store %arg5[%c0_22, %c0_23], %30 {strides = array<i32>} : memref<8x1xf32, #tpu.memory_space<vmem>>, vector<8x1xf32>,
    } else {
    }
    %c0 = arith.constant 0 : index
    %c0_1 = arith.constant 0 : index
    %3 = vector.load %arg2[%c0, %c0_1] : memref<8x1024xf32, #tpu.memory_space<vmem>>, vector<8x1024xf32>
    %c0_2 = arith.constant 0 : index
    %c0_3 = arith.constant 0 : index
    %4 = vector.load %arg3[%c0_2, %c0_3] : memref<8x1024xf32, #tpu.memory_space<vmem>>, vector<8x1024xf32>
    %5 = arith.subf %4, %3 : vector<8x1024xf32>
    %6 = math.absf %5 : vector<8x1024xf32>
    %cst = arith.constant 1.000000e-01 : f32
    %7 = vector.broadcast %cst : f32 to vector<8x1024xf32>
    %8 = arith.cmpf ogt, %6, %7 : vector<8x1024xf32>
    %c0_4 = arith.constant 0 : index
    %c0_5 = arith.constant 0 : index
    %9 = vector.load %arg4[%c0_4, %c0_5] : memref<8x1xf32, #tpu.memory_space<vmem>>, vector<8x1xf32>
    %cst_6 = arith.constant 0.000000e+00 : f32
    %10 = vector.broadcast %cst_6 : f32 to vector<8x1024xf32>
    %11 = arith.select %8, %4, %10 : vector<8x1024xi1>, vector<8x1024xf32>
    %cst_7 = arith.constant 9.99999997E-7 : f32
    %12 = vector.broadcast %cst_7 : f32 to vector<8x1024xf32>
    %13 = arith.addf %3, %12 : vector<8x1024xf32>
    %14 = math.log %13 : vector<8x1024xf32>
    %15 = arith.mulf %11, %14 : vector<8x1024xf32>
    %cst_8 = arith.constant dense<0.000000e+00> : vector<8xf32>
    %16 = vector.multi_reduction <add>, %15, %cst_8 [1] : vector<8x1024xf32> to vector<8xf32>
    %17 = vector.shape_cast %16 : vector<8xf32> to vector<8x1xf32>
    %18 = arith.addf %9, %17 : vector<8x1xf32>
    %c0_9 = arith.constant 0 : index
    %c0_10 = arith.constant 0 : index
    %19 = vector.load %arg4[%c0_9, %c0_10] : memref<8x1xf32, #tpu.memory_space<vmem>>, vector<8x1xf32>
    tpu.vector_store %arg4[%c0_9, %c0_10], %18 {strides = array<i32>} : memref<8x1xf32, #tpu.memory_space<vmem>>, vector<8x1xf32>,
    %c0_11 = arith.constant 0 : index
    %c0_12 = arith.constant 0 : index
    %20 = vector.load %arg5[%c0_11, %c0_12] : memref<8x1xf32, #tpu.memory_space<vmem>>, vector<8x1xf32>
    %cst_13 = arith.constant 1.000000e+00 : f32
    %cst_14 = arith.constant 0.000000e+00 : f32
    %21 = vector.broadcast %cst_13 : f32 to vector<8x1024xf32>
    %22 = vector.broadcast %cst_14 : f32 to vector<8x1024xf32>
    %23 = arith.select %8, %21, %22 : vector<8x1024xi1>, vector<8x1024xf32>
    %cst_15 = arith.constant dense<0.000000e+00> : vector<8xf32>
    %24 = vector.multi_reduction <add>, %23, %cst_15 [1] : vector<8x1024xf32> to vector<8xf32>
    %25 = vector.shape_cast %24 : vector<8xf32> to vector<8x1xf32>
    %26 = arith.addf %20, %25 : vector<8x1xf32>
    %c0_16 = arith.constant 0 : index
    %c0_17 = arith.constant 0 : index
    %27 = vector.load %arg5[%c0_16, %c0_17] : memref<8x1xf32, #tpu.memory_space<vmem>>, vector<8x1xf32>
    tpu.vector_store %arg5[%c0_16, %c0_17], %26 {strides = array<i32>} : memref<8x1xf32, #tpu.memory_space<vmem>>, vector<8x1xf32>,
    return
  }
  func.func @transform_0(%arg0: i32, %arg1: i32) -> (i32, i32) {
    %c0_i32 = arith.constant 0 : i32
    return %arg0, %arg1 : i32, i32
  }
  func.func @transform_1(%arg0: i32, %arg1: i32) -> (i32, i32) {
    %c0_i32 = arith.constant 0 : i32
    return %arg0, %arg1 : i32, i32
  }
  func.func @transform_2(%arg0: i32, %arg1: i32) -> (i32, i32) {
    %c0_i32 = arith.constant 0 : i32
    %c0_i32_0 = arith.constant 0 : i32
    return %arg0, %c0_i32 : i32, i32
  }
  func.func @transform_3(%arg0: i32, %arg1: i32) -> (i32, i32) {
    %c0_i32 = arith.constant 0 : i32
    %c0_i32_0 = arith.constant 0 : i32
    return %arg0, %c0_i32 : i32, i32
  }
}

</mosaic_0001>

<bundles_post_ra>
// kernel: tpu_custom_call.1
= control target key start
LH: loop header
LB: loop body
LE: loop exit
PB: predicated region body
PF: predicated region fallthrough
CT: control target
= control target key end

     0   :  { %9 = vsyncpa [#allocation3], 0  ;;  %s925_s0 = inlined_call_operand.hbm [shape: f32[16,1024], index: 0, kind: input, shape index: {}]   ;;  %s926_s1 = inlined_call_operand.hbm [shape: f32[16,1024], index: 1, kind: input, shape index: {}]   ;;  %s927_s2 = inlined_call_operand.vmem [shape: f32[16,1], index: 2, kind: output, shape index: {0}]   ;;  %s928_s3 = inlined_call_operand.vmem [shape: f32[16,1], index: 3, kind: output, shape index: {1}]  }
   0x1   :  { %11 = vsyncpa [#allocation3 + $0x1], 0 }
   0x2   :  { %12 = vsyncpa [#allocation5], 0 }
   0x3   :  { %14 = vsyncpa [#allocation5 + $0x1], 0  ;;  %s742_s12 = smov 0   ;;  %s744_s13 = smov 0  }
   0x4   :  { %s746_s14 = smov 0   ;;  %s748_s15 = smov 0  }
   0x5   :  { %s750_s16 = smov 0   ;;  %s752_s17 = smov 0  }
   0x6 LB: > { %s511_s18 = sadd.s32 4294967295, %s717_s17   ;;  %s32_s19 = sadd.s32 1, %s713_s16  ;;  %s717_s17 = sphi %s752_s17, %s20_s17   ;;  %s713_s16 = sphi %s750_s16, %s937_s16   ;;  %s709_s15 = sphi %s748_s15, %s936_s15   ;;  %s705_s14 = sphi %s746_s14, %s935_s14   ;;  %s701_s13 = sphi %s744_s13, %s934_s13   ;;  %s697_s12 = sphi %s742_s12, %s933_s12  }
   0x7   : > { %p34_p0 = scmp.ge.s32.totalorder %s32_s19, 2  ;;  %s41_s20 = sadd.s32 1, %s705_s14 }
   0x8   : > { %p48_p1 = scmp.ne.s32.totalorder %s705_s14, %s701_s13  ;;  %p49_p2 = scmp.eq.s32.totalorder %s717_s17, 0 }
   0x9   : > { %s939_s19 = smov (%p34_p0, %s32_s19), 0  ;;  %p54_p4 = scmp.ne.s32.totalorder %s701_s13, %s697_s12 }
   0xa   : > { %p778_p3 = por %p49_p2, %p48_p1  ;;  %s36_s22 = ssub.s32 %s713_s16, %s939_s19 }
   0xb   : > { %p55_p5 = scmp.eq.s32.totalorder %s511_s18, 0  ;;  %p39_p6 = scmp.eq.s32.totalorder %s36_s22, 0 }
   0xc   : > { %p541_p8 = scmp.lt.s32.totalorder %s717_s17, 2  ;;  %s794_s25 = sand.u32 1, %s705_s14  }
   0xd   : > { %p785_p7 = por %p55_p5, %p54_p4  ;;  %s528_s26 = sshll.u32 %s713_s16, 10 }
   0xe   : > { %s791_s24 = scalar_select %p39_p6, %s705_s14, %s41_s20  }
   0xf   : > { %s515_s27 = sshll.u32 %s794_s25, 6  ;;  %s170_s30 = scalar_lea.hbm %s925_s0, %s528_s26 }
  0x10   : > { %s162_s4 = scalar_lea.vmem [#allocation2], %s515_s27  ;;  %p803_p9 = pnand %p541_p8, %p778_p3 }
  0x11   : > { %s172_s5 = sshll.u32 %s162_s4, 4  ;;  %p521_p10 = scmp.ge.s32.totalorder %s717_s17, 1  ;;  %s173_s5 = int_to_ptr.vmem [resolvable:$true] %s172_s5 }
  0x12   : > { %p198_p11 = scmp.lt.s32.totalorder %s717_s17, 3  ;;  %s159_s7 = scalar_lea.sflag [#allocation3], %s794_s25 }
  0x13   : > { %p609_p12 = pneg %p803_p9  ;;  %s620_s8 = scalar_lea.vmem %s173_s5, 1024 }
  0x14   : > { %p621_p13 = scmp.ne.s32.totalorder %s173_s5, %s620_s8  ;;  %s719_s9 = smov [#allocation2]  }
  0x15   : > { %s625_s10 = sshll.u32 %s719_s9, 4  ;;  %s626_s10 = int_to_ptr.vmem [resolvable:$false] %s625_s10 }
  0x16   : > { %p623_p0 = pnand %p621_p13, %p609_p12  ;;  %s627_s11 = scalar_lea.vmem %s626_s10, 2048 }
  0x17   : > { %p628_p2 = scmp.lt.s32.totalorder %s173_s5, %s626_s10  ;;  %p629_p3 = scmp.lt.s32.totalorder %s627_s11, %s620_s8 }
  0x18   : > { %p624_p1 = pneg %p623_p0 }
  0x19   : > { %p630_p4 = por %p629_p3, %p628_p2 }
  0x1b   : > { %p631_p5 = pnand %p630_p4, %p624_p1 }
  0x1d   : > { %634 = shalt.err (!%p631_p5)
}
  0x1e   : > { %537 = dma.hbm_to_vmem [thread:$0]  (!%p803_p9), %s170_s30, 1024, %s173_s5, %s159_s7  }
  0x1f   : > { %p821_p6 = pnand %p521_p10, %p198_p11  ;;  %s191_s21 = scalar_lea.hbm %s926_s1, %s528_s26 }
  0x20   : > { %s183_s22 = scalar_lea.vmem [#allocation4], %s515_s27  ;;  %s180_s29 = scalar_lea.sflag [#allocation5], %s794_s25 }
  0x21   : > { %s193_s28 = sshll.u32 %s183_s22, 4  ;;  %s720_s30 = smov [#allocation4]   ;;  %s194_s28 = int_to_ptr.vmem [resolvable:$true] %s193_s28 }
  0x22   : > { %s648_s4 = scalar_lea.vmem %s194_s28, 1024  ;;  %s653_s5 = sshll.u32 %s720_s30, 4  ;;  %s654_s5 = int_to_ptr.vmem [resolvable:$false] %s653_s5 }
  0x23   : > { %p649_p8 = scmp.ne.s32.totalorder %s194_s28, %s648_s4  ;;  %s655_s7 = scalar_lea.vmem %s654_s5, 2048 }
  0x24   : > { %p656_p10 = scmp.lt.s32.totalorder %s194_s28, %s654_s5  ;;  %p657_p11 = scmp.lt.s32.totalorder %s655_s7, %s648_s4 }
  0x25   : > { %p651_p13 = pnand %p649_p8, %p609_p12 }
  0x26   : > { %p658_p1 = por %p657_p11, %p656_p10 }
  0x27   : > { %p652_p0 = pneg %p651_p13 }
  0x29   : > { %p659_p2 = pnand %p658_p1, %p652_p0 }
  0x2b   : > { %662 = shalt.err (!%p659_p2)
}
  0x2c   : > { %540 = dma.hbm_to_vmem [thread:$0]  (!%p803_p9), %s191_s21, 1024, %s194_s28, %s180_s29  }
  0x2d   : > { %202 = sbr.rel (%p821_p6) target bundleno = 234 (0xea), region = 28  ;;  %s204_s25 = sand.u32 (!%p821_p6), 1, %s701_s13  }
  0x2e   : > { %s522_s26 = sshll.u32 (!%p821_p6), %s204_s25, 6  ;;  %s205_s27 = scalar_lea.sflag (!%p821_p6), [#allocation3], %s204_s25 }
  0x2f   : > { %s837_s8 = scalar_lea.vmem (!%p821_p6), [#allocation2], %s522_s26 }
  0x32   : > { %688 = dma.done.wait (%p785_p7), %s205_s27, 1024  }
  0x33   : > { %690 = vsyncadd (%p785_p7), %s205_s27, 4294966272  ;;  %s214_s9 = scalar_lea.sflag [#allocation5], %s204_s25  ;;  %s843_s10 = scalar_lea.vmem [#allocation4], %s522_s26 }
  0x34   : > { %692 = dma.done.wait (%p785_p7), %s214_s9, 1024  }
  0x35   : > { %694 = vsyncadd (%p785_p7), %s214_s9, 4294966272  ;;  %p250_p9 = scmp.lt.s32.totalorder %s709_s15, 1  ;;  %vm262_vm0 = vcmask 7168   ;;  %v721_v0 = vmov 0.0   ;;  %v265_v1 = vld [vmem:[%s837_s8] sm:$0xff]  ;;  %v266_v2 = vld [vmem:[%s837_s8 + $0x8] sm:$0xff] }
  0x36   : > { %v267_v3 = vld [vmem:[%s837_s8 + $0x10] sm:$0xff]  ;;  %v314_v4 = vadd.f32 1e-06, %v265_v1  ;;  %v268_v5 = vld [vmem:[%s837_s8 + $0x18] sm:$0xff]  ;;  %v273_v6 = vld [vmem:[%s843_s10] sm:$0xff] }
  0x37   : > { %s941_s15 = smov (!%p250_p9, %s709_s15), 1  ;;  %v274_v7 = vld [vmem:[%s843_s10 + $0x8] sm:$0xff]  ;;  %v315_v8 = vadd.f32 1e-06, %v266_v2  ;;  %v281_v9 = vsub.f32 %v273_v6, %v265_v1  ;;  %v316_v11 = vadd.f32 1e-06, %v267_v3 }
  0x38   : > { %s524_s6 = sshll.u32 %s941_s15, 3  ;;  %591 = vlog2.f32 %v314_v4  ;;  %v282_v10 = vsub.f32 %v274_v7, %v266_v2  ;;  %v275_v12 = vld [vmem:[%s843_s10 + $0x10] sm:$0xff]  ;;  %v317_v13 = vadd.f32 1e-06, %v268_v5  ;;  %v276_v14 = vld [vmem:[%s843_s10 + $0x18] sm:$0xff]  ;;  %v269_v18 = vld [vmem:[%s837_s8 + $0x20] sm:$0xff] }
  0x39   : > { %s859_s23 = scalar_lea.vmem %s927_s2, %s524_s6  ;;  %593 = vlog2.f32 %v315_v8  ;;  %v283_v15 = vsub.f32 %v275_v12, %v267_v3  ;;  %v289_v16 = vand.u32 2147483647, %v281_v9  ;;  %v270_v19 = vld [vmem:[%s837_s8 + $0x28] sm:$0xff]  ;;  %v271_v20 = vld [vmem:[%s837_s8 + $0x30] sm:$0xff]  ;;  %v272_v21 = vld [vmem:[%s837_s8 + $0x38] sm:$0xff]  ;;  %v284_v23 = vsub.f32 %v276_v14, %v268_v5  ;;  %s257_s21 = scalar_lea.vmem %s928_s3, %s524_s6 }
  0x3a   : > { %263 = vst.msk [vmem:[%s859_s23] sm:$0xff] %vm262_vm0, %v721_v0  ;;  %v290_v17 = vand.u32 2147483647, %v282_v10  ;;  %595 = vlog2.f32 %v316_v11  ;;  %v277_v22 = vld [vmem:[%s843_s10 + $0x20] sm:$0xff]  ;;  %v318_v25 = vadd.f32 1e-06, %v269_v18 }
  0x3b   : > { %597 = vlog2.f32 %v317_v13  ;;  %v291_v24 = vand.u32 2147483647, %v283_v15  ;;  %vm297_vm1 = vcmp.gt.f32.partialorder %v289_v16, 0.1  ;;  %v319_v26 = vadd.f32 1e-06, %v270_v19 }
  0x3c   : > { %vm298_vm2 = vcmp.gt.f32.partialorder %v290_v17, 0.1  ;;  %v320_v27 = vadd.f32 1e-06, %v271_v20  ;;  %v321_v28 = vadd.f32 1e-06, %v272_v21  ;;  %599 = vlog2.f32 %v318_v25 }
  0x3d   : > { %v359_v29 = vsel %vm297_vm1, 1.0, %v721_v0  ;;  %v360_v30 = vsel %vm298_vm2, 1.0, %v721_v0  ;;  %v278_v31 = vld [vmem:[%s843_s10 + $0x28] sm:$0xff]  ;;  %v292_v32 = vand.u32 2147483647, %v284_v23  ;;  %v279_v34 = vld [vmem:[%s843_s10 + $0x30] sm:$0xff]  ;;  %v285_v35 = vsub.f32 %v277_v22, %v269_v18 }
  0x3e   : > { %601 = vlog2.f32 %v319_v26  ;;  %v280_v36 = vld [vmem:[%s843_s10 + $0x38] sm:$0xff]  ;;  %vm299_vm3 = vcmp.gt.f32.partialorder %v291_v24, 0.1  ;;  %v367_v38 = vadd.f32 %v360_v30, %v359_v29  ;;  %v286_v39 = vsub.f32 %v278_v31, %v270_v19  ;;  %264 = vst.msk [vmem:[%s257_s21] sm:$0xff] %vm262_vm0, %v721_v0 }
  0x3f   : > { %603 = vlog2.f32 %v320_v27  ;;  %v306_v40 = vsel %vm297_vm1, %v273_v6, 0.0  ;;  %v361_v41 = vsel %vm299_vm3, 1.0, %v721_v0  ;;  %v287_v42 = vsub.f32 %v279_v34, %v271_v20 }
  0x40   : > { %605 = vlog2.f32 %v321_v28  ;;  %vm300_vm4 = vcmp.gt.f32.partialorder %v292_v32, 0.1  ;;  %v288_v44 = vsub.f32 %v280_v36, %v272_v21  ;;  %v293_v45 = vand.u32 2147483647, %v285_v35 }
  0x41   : > { %v307_v46 = vsel %vm298_vm2, %v274_v7, 0.0  ;;  %v308_v48 = vsel %vm299_vm3, %v275_v12, 0.0  ;;  %v368_v51 = vadd.f32 %v367_v38, %v361_v41  ;;  %v294_v53 = vand.u32 2147483647, %v286_v39  ;;  %v305_v32 = vld [vmem:[%s859_s23] sm:$0xff] }
  0x42   : > { %v309_v54 = vsel %vm300_vm4, %v276_v14, 0.0  ;;  %v362_v56 = vsel %vm300_vm4, 1.0, %v721_v0  ;;  %v295_v57 = vand.u32 2147483647, %v287_v42  ;;  %v296_v60 = vand.u32 2147483647, %v288_v44 }
  0x43   : > { %vm301_vm5 = vcmp.gt.f32.partialorder %v293_v45, 0.1  ;;  %v369_v1 = vadd.f32 %v368_v51, %v362_v56  ;;  %vm302_vm6 = vcmp.gt.f32.partialorder %v294_v53, 0.1 }
  0x44   : > { %v363_v2 = vsel %vm301_vm5, 1.0, %v721_v0  ;;  %vm303_vm7 = vcmp.gt.f32.partialorder %v295_v57, 0.1  ;;  %vm304_vm8 = vcmp.gt.f32.partialorder %v296_v60, 0.1  ;;  %v310_v5 = vsel %vm301_vm5, %v277_v22, 0.0 }
  0x45   : > { %v592_v33 = vpop.eup %591  ;;  %v311_v7 = vsel %vm302_vm6, %v278_v31, 0.0  ;;  %v370_v10 = vadd.f32 %v369_v1, %v363_v2  ;;  %v312_v12 = vsel %vm303_vm7, %v279_v34, 0.0  ;;  %v364_v14 = vsel %vm302_vm6, 1.0, %v721_v0  ;;  %v358_v35 = vld [vmem:[%s257_s21] sm:$0xff] }
  0x46   : > { %v323_v37 = vmul.f32 0.6931472, %v592_v33  ;;  %v594_v43 = vpop.eup %593  ;;  %v313_v18 = vsel %vm304_vm8, %v280_v36, 0.0  ;;  %v365_v24 = vsel %vm303_vm7, 1.0, %v721_v0  ;;  %v366_v29 = vsel %vm304_vm8, 1.0, %v721_v0 }
  0x47   : > { %v596_v47 = vpop.eup %595  ;;  %v325_v49 = vmul.f32 0.6931472, %v594_v43  ;;  %v371_v23 = vadd.f32 %v370_v10, %v364_v14 }
  0x48   : > { %v338_v50 = vmul.f32 %v323_v37, %v306_v40  ;;  %v598_v52 = vpop.eup %597  ;;  %v327_v55 = vmul.f32 0.6931472, %v596_v47 }
  0x49   : > { %v329_v58 = vmul.f32 0.6931472, %v598_v52  ;;  %v339_v59 = vmul.f32 %v325_v49, %v307_v46  ;;  %v600_v4 = vpop.eup %599  ;;  %v372_v28 = vadd.f32 %v371_v23, %v365_v24 }
  0x4a   : > { %v340_v61 = vmul.f32 %v327_v55, %v308_v48  ;;  %v331_v8 = vmul.f32 0.6931472, %v600_v4 }
  0x4b   : > { %v341_v62 = vmul.f32 %v329_v58, %v309_v54  ;;  %v346_v63 = vadd.f32 %v339_v59, %v338_v50  ;;  %v602_v6 = vpop.eup %601  ;;  %v373_v31 = vadd.f32 %v372_v28, %v366_v29 }
  0x4c   : > { %v604_v11 = vpop.eup %603  ;;  %v333_v13 = vmul.f32 0.6931472, %v602_v6  ;;  %v342_v17 = vmul.f32 %v331_v8, %v310_v5 }
  0x4d   : > { %v347_v3 = vadd.f32 %v346_v63, %v340_v61  ;;  %v606_v15 = vpop.eup %605  ;;  %v335_v16 = vmul.f32 0.6931472, %v604_v11 }
  0x4e   : > { %v337_v19 = vmul.f32 0.6931472, %v606_v15  ;;  %v343_v20 = vmul.f32 %v333_v13, %v311_v7 }
  0x4f   : > { %v348_v9 = vadd.f32 %v347_v3, %v341_v62  ;;  %v344_v21 = vmul.f32 %v335_v16, %v312_v12 }
  0x50   : > { %v345_v25 = vmul.f32 %v337_v19, %v313_v18 }
  0x51   : > { %v349_v22 = vadd.f32 %v348_v9, %v342_v17 }
  0x53   : > { %v350_v26 = vadd.f32 %v349_v22, %v343_v20 }
  0x55   : > { %v351_v27 = vadd.f32 %v350_v26, %v344_v21 }
  0x57   : > { %v352_v30 = vadd.f32 %v351_v27, %v345_v25 }
  0x59   : > { %353 = vadd.xlane.f32.xlu0 %v352_v30 }
  0x5d   : > { %374 = vadd.xlane.f32.xlu0 %v373_v31 }
  0xe2   : > { %v354_v33 = vpop.xlane.xlu0 %353 }
  0xe3   : > { %v355_v34 = vadd.f32 %v354_v33, %v305_v32 }
  0xe5   : > { %357 = vst.msk [vmem:[%s859_s23] sm:$0xff] %vm262_vm0, %v355_v34 }
  0xe6   : > { %v375_v36 = vpop.xlane.xlu0 %374 }
  0xe7   : > { %v376_v37 = vadd.f32 %v375_v36, %v358_v35 }
  0xe9   : > { %377 = vst.msk [vmem:[%s257_s21] sm:$0xff] %vm262_vm0, %v376_v37 }
  0xea PF: > { %s20_s17 = sadd.s32 1, %s717_s17   ;;  %s933_s12 = smov %s701_s13 }
  0xeb   : > { %p17_p7 = scmp.ge.s32.totalorder %s20_s17, 4   ;;  %s934_s13 = smov %s705_s14 }
  0xec   : > { %s935_s14 = smov %s791_s24  ;;  %s936_s15 = smov %s713_s16 }
  0xed   : > { %s937_s16 = smov %s939_s19  ;;  %19 = sbr.rel (!%p17_p7) target bundleno = 6 (0x6), region = 97 }
  0xf2   :  { %411 = vsyncpa [#allocation3], 1 }
  0xf3   :  { %413 = vsyncpa [#allocation3 + $0x1], 1 }
  0xf4   :  { %414 = vsyncpa [#allocation5], 1 }
  0xf5   :  { %416 = vsyncpa [#allocation5 + $0x1], 1 }

</bundles_post_ra>
